<compile_context>
chip_gen: v5e
topology: v5e:2x2
jax: 0.10.0
libtpu: 0.0.40
codegen_flags: <defaults>
</compile_context>

<pallas_src>
import functools

import jax
import jax.numpy as jnp
from jax.experimental import pallas as pl
from jax.experimental.pallas import tpu as pltpu


def _rup(v, m):
    return ((v + m - 1) // m) * m


def pack_params(params):
    """One-time packing of the 10 parameter tensors into a single f32 slab.

    Call ONCE when parameters are loaded; the per-call jitted forward only sees
    the packed slab (no per-call concat/pad/cast XLA prologue).
    """
    (w1_root, w1_rel, b1, w2_root, w2_rel, b2, wf1, bf1, wf2, bf2) = params
    del bf2  # fc2 bias is cancelled exactly by the final mean-centering.
    r0, r1 = w1_root.shape
    r2 = w2_root.shape[1]
    n1 = wf1.shape[1]

    lane = max(r0, r1, r2)
    off = {}
    row = 0

    def take(name, rows):
        nonlocal row
        off[name] = row
        row = _rup(row + rows, 8)          # 8-row (f32 sublane-tile) alignment

    take("w1r", r1); take("w1l", r1)
    take("w2r", r2); take("w2l", r2)
    take("wf1", n1)
    take("b1", r1); take("b2", r2); take("bf1", n1); take("wf2", n1)

    slab = jnp.zeros((row, lane), jnp.float32)
    slab = slab.at[off["w1r"]:off["w1r"] + r1, :r0].set(w1_root.T)
    slab = slab.at[off["w1l"]:off["w1l"] + r1, :r0].set(w1_rel.T)
    slab = slab.at[off["w2r"]:off["w2r"] + r2, :r1].set(w2_root.T)
    slab = slab.at[off["w2l"]:off["w2l"] + r2, :r1].set(w2_rel.T)
    slab = slab.at[off["wf1"]:off["wf1"] + n1, :r2].set(wf1.T)
    slab = slab.at[off["b1"]:off["b1"] + r1, 0].set(b1.reshape(-1))
    slab = slab.at[off["b2"]:off["b2"] + r2, 0].set(b2.reshape(-1))
    slab = slab.at[off["bf1"]:off["bf1"] + n1, 0].set(bf1.reshape(-1))
    slab = slab.at[off["wf2"]:off["wf2"] + n1, 0].set(wf2.reshape(-1))

    meta = dict(r0=r0, r1=r1, r2=r2, n1=n1, off=off)
    return jax.device_put(slab), meta


def _gcn_kernel(edge_ref, xt_ref, p_ref, o_ref, *, r0, r1, r2, n1, off):
    f32 = jnp.float32
    N = xt_ref.shape[1]
    E = edge_ref.shape[1]
    P = p_ref[...]                                            # param slab (f32)

    # ---- dense transposed adjacency built in-kernel from edge_index ----
    # AT[s, d] = #edges s->d, so (A @ x)^T == x^T @ AT for the 'add' aggregation.
    src = edge_ref[0:1, :]                                    # (1, E) int32
    dst = edge_ref[1:2, :]                                    # (1, E) int32
    node_ids = jax.lax.broadcasted_iota(jnp.int32, (N, E), 0)
    osrc = (node_ids == src).astype(f32)                      # (N, E) one-hot rows
    odst = (node_ids == dst).astype(f32)                      # (N, E)
    AT = jax.lax.dot_general(osrc, odst, (((1,), (1,)), ((), ())),
                             preferred_element_type=f32)      # (N, N)
    # TODO(synk): for large sparse graphs replace the dense AT / A@x aggregation
    #             with a CSR gather + segment-sum kernel (PrefetchScalarGridSpec).

    XT = xt_ref[...]                                          # (r0, N)
    w1r = P[off["w1r"]:off["w1r"] + r1, :r0]
    w1l = P[off["w1l"]:off["w1l"] + r1, :r0]
    w2r = P[off["w2r"]:off["w2r"] + r2, :r1]
    w2l = P[off["w2l"]:off["w2l"] + r2, :r1]
    wf1t = P[off["wf1"]:off["wf1"] + n1, :r2]
    b1 = P[off["b1"]:off["b1"] + r1, 0:1]
    b2 = P[off["b2"]:off["b2"] + r2, 0:1]
    bf1 = P[off["bf1"]:off["bf1"] + n1, 0:1]
    wf2c = P[off["wf2"]:off["wf2"] + n1, 0:1]

    # --- GraphConv 1 (root + rel as two small f32 MXU passes) + ReLU ---
    agg1 = jnp.dot(XT, AT, preferred_element_type=f32)        # (r0, N)
    h1 = jnp.maximum(
        jnp.dot(w1r, XT, preferred_element_type=f32)
        + jnp.dot(w1l, agg1, preferred_element_type=f32) + b1, 0.0)   # (r1, N)

    # --- GraphConv 2 + ReLU ---
    agg2 = jnp.dot(h1, AT, preferred_element_type=f32)        # (r1, N)
    h2 = jnp.maximum(
        jnp.dot(w2r, h1, preferred_element_type=f32)
        + jnp.dot(w2l, agg2, preferred_element_type=f32) + b2, 0.0)   # (r2, N)

    # --- fc1 + ReLU ---
    h3 = jnp.maximum(
        jnp.dot(wf1t, h2, preferred_element_type=f32) + bf1, 0.0)     # (n1, N)

    # --- fc2 as VPU multiply + sublane reduce (no 1-wide MXU pass), then
    #     mean-center; fc2 bias is cancelled by the centering.  Output is a
    #     lane-dense (1, N) store. ---
    out = jnp.sum(h3 * wf2c, axis=0, keepdims=True)                   # (1, N)
    o_ref[...] = out - jnp.mean(out)


def make_gcn_forward(meta):
    """Build the jitted forward for a fixed parameter layout."""
    kernel = functools.partial(
        _gcn_kernel, r0=meta["r0"], r1=meta["r1"], r2=meta["r2"],
        n1=meta["n1"], off=meta["off"])
    vmem = pl.BlockSpec(memory_space=pltpu.MemorySpace.VMEM)

    # TODO(synk): to use more lanes / the 2 v7x TensorCores, batch several
    #             graphs per call (block-diagonal AT or a "parallel" graph axis)
    #             so the node/lane dimension reaches >=128; at N=32 a grid would
    #             only add serial overhead.
    @jax.jit
    def forward(x, edge_index, pslab):
        N = x.shape[0]
        xt = x.T                                  # feature-major: nodes on lanes
        out_row = pl.pallas_call(
            kernel,
            out_shape=jax.ShapeDtypeStruct((1, N), jnp.float32),
            in_specs=[vmem, vmem, vmem],
            out_specs=vmem,
        )(edge_index.astype(jnp.int32), xt.astype(jnp.float32), pslab)
        return out_row.reshape(N, 1)

    return forward


def init_params(key, r0, r1, r2, n1):
    ks = jax.random.split(key, 8)

    def w(k, fan_in, fan_out):
        return (jax.random.normal(k, (fan_in, fan_out), jnp.float32)
                / jnp.sqrt(jnp.float32(fan_in)))

    w1_root = w(ks[0], r0, r1)            # GraphConv1 lin_root (no bias)
    w1_rel = w(ks[1], r0, r1)             # GraphConv1 lin_rel
    b1 = 0.01 * jax.random.normal(ks[2], (1, r1), jnp.float32)
    w2_root = w(ks[3], r1, r2)            # GraphConv2 lin_root (no bias)
    w2_rel = w(ks[4], r1, r2)             # GraphConv2 lin_rel
    b2 = 0.01 * jax.random.normal(ks[5], (1, r2), jnp.float32)
    wf1 = w(ks[6], r2, n1)                # fc1
    bf1 = jnp.zeros((1, n1), jnp.float32)
    wf2 = w(ks[7], n1, 1)                 # fc2
    bf2 = jnp.zeros((1, 1), jnp.float32)
    return (w1_root, w1_rel, b1, w2_root, w2_rel, b2, wf1, bf1, wf2, bf2)


def reference_forward(x, edge_index, params):
    """Pure-JAX reference with GraphConv(aggr='add') semantics."""
    (w1_root, w1_rel, b1, w2_root, w2_rel, b2, wf1, bf1, wf2, bf2) = params
    src, dst = edge_index[0], edge_index[1]

    def conv(h, wr, wl, b):
        agg = jnp.zeros_like(h).at[dst].add(h[src])
        return h @ wr + agg @ wl + b

    h = jax.nn.relu(conv(x, w1_root, w1_rel, b1))
    h = jax.nn.relu(conv(h, w2_root, w2_rel, b2))
    h = jax.nn.relu(h @ wf1 + bf1)
    out = h @ wf2 + bf2
    return out - jnp.mean(out)


if __name__ == "__main__":
    # N=32 nodes, raw feature size 8, gcn_hidden_layer_sizes=[8, 16], nn hidden 32
    N, E = 32, 64
    r0, (r1, r2), n1 = 8, (8, 16), 32

    key = jax.random.PRNGKey(0)
    kx, ke, kp = jax.random.split(key, 3)

    x = jax.random.normal(kx, (N, r0), jnp.float32)
    edge_index = jax.random.randint(ke, (2, E), 0, N, dtype=jnp.int32)
    params = init_params(kp, r0, r1, r2, n1)

    pslab, meta = pack_params(params)          # one-time, outside the jit path
    forward = make_gcn_forward(meta)

    out = forward(x, edge_index, pslab)
    out = jax.block_until_ready(out)

    assert out.shape == (N, 1)
    assert bool(jnp.all(jnp.isfinite(out)))
    ref = reference_forward(x, edge_index, params)
    assert float(jnp.max(jnp.abs(out - ref))) < 5e-2
    print("KERNEL_OK")
</pallas_src>

<mosaic_0001>
module attributes {stable_mosaic.version = 11 : i64} {
  func.func @_gcn_kernel(%arg0: memref<2x64xi32, #tpu.memory_space<vmem>>, %arg1: memref<8x32xf32, #tpu.memory_space<vmem>>, %arg2: memref<168x16xf32, #tpu.memory_space<vmem>>, %arg3: memref<1x32xf32, #tpu.memory_space<vmem>>) attributes {dimension_semantics = [], scalar_prefetch = 0 : i64, scratch_operands = 0 : i64, tpu.core_type = #tpu.core_type<tc>} {
    %c0 = arith.constant 0 : index
    %c0_0 = arith.constant 0 : index
    %0 = vector.load %arg2[%c0, %c0_0] : memref<168x16xf32, #tpu.memory_space<vmem>>, vector<168x16xf32>
    %c0_1 = arith.constant 0 : index
    %c0_2 = arith.constant 0 : index
    %1 = vector.load %arg0[%c0_1, %c0_2] : memref<2x64xi32, #tpu.memory_space<vmem>>, vector<1x64xi32>
    %c1 = arith.constant 1 : index
    %c0_3 = arith.constant 0 : index
    %2 = vector.load %arg0[%c1, %c0_3] : memref<2x64xi32, #tpu.memory_space<vmem>>, vector<1x64xi32>
    %3 = tpu.iota {dimensions = array<i32: 0>} : vector<32x64xi32>
    %4 = vector.broadcast %1 : vector<1x64xi32> to vector<32x64xi32>
    %5 = arith.cmpi eq, %3, %4 : vector<32x64xi32>
    %6 = arith.extui %5 : vector<32x64xi1> to vector<32x64xi32>
    %7 = arith.sitofp %6 : vector<32x64xi32> to vector<32x64xf32>
    %8 = vector.broadcast %2 : vector<1x64xi32> to vector<32x64xi32>
    %9 = arith.cmpi eq, %3, %8 : vector<32x64xi32>
    %10 = arith.extui %9 : vector<32x64xi1> to vector<32x64xi32>
    %11 = arith.sitofp %10 : vector<32x64xi32> to vector<32x64xf32>
    %cst = arith.constant dense<0.000000e+00> : vector<32x32xf32>
    %12 = tpu.matmul %7, %11, %cst {dimension_numbers = #tpu.dot_dimension_numbers<[1], [1], [0], [0], [0, 0, 1, 0], [], []>} : vector<32x64xf32>, vector<32x64xf32>, vector<32x32xf32> -> vector<32x32xf32>
    %c0_4 = arith.constant 0 : index
    %c0_5 = arith.constant 0 : index
    %13 = vector.load %arg1[%c0_4, %c0_5] : memref<8x32xf32, #tpu.memory_space<vmem>>, vector<8x32xf32>
    %14 = vector.extract_strided_slice %0 {offsets = [0, 0], sizes = [8, 8], strides = [1, 1]} : vector<168x16xf32> to vector<8x8xf32>
    %15 = vector.extract_strided_slice %0 {offsets = [8, 0], sizes = [8, 8], strides = [1, 1]} : vector<168x16xf32> to vector<8x8xf32>
    %16 = vector.extract_strided_slice %0 {offsets = [16, 0], sizes = [16, 8], strides = [1, 1]} : vector<168x16xf32> to vector<16x8xf32>
    %17 = vector.extract_strided_slice %0 {offsets = [32, 0], sizes = [16, 8], strides = [1, 1]} : vector<168x16xf32> to vector<16x8xf32>
    %18 = vector.extract_strided_slice %0 {offsets = [48, 0], sizes = [32, 16], strides = [1, 1]} : vector<168x16xf32> to vector<32x16xf32>
    %19 = vector.extract_strided_slice %0 {offsets = [80, 0], sizes = [8, 1], strides = [1, 1]} : vector<168x16xf32> to vector<8x1xf32>
    %20 = vector.extract_strided_slice %0 {offsets = [88, 0], sizes = [16, 1], strides = [1, 1]} : vector<168x16xf32> to vector<16x1xf32>
    %21 = vector.extract_strided_slice %0 {offsets = [104, 0], sizes = [32, 1], strides = [1, 1]} : vector<168x16xf32> to vector<32x1xf32>
    %22 = vector.extract_strided_slice %0 {offsets = [136, 0], sizes = [32, 1], strides = [1, 1]} : vector<168x16xf32> to vector<32x1xf32>
    %cst_6 = arith.constant dense<0.000000e+00> : vector<8x32xf32>
    %23 = tpu.matmul %13, %12, %cst_6 {dimension_numbers = #tpu.dot_dimension_numbers<[1], [0], [0], [1], [0, 0, 1, 1], [], []>} : vector<8x32xf32>, vector<32x32xf32>, vector<8x32xf32> -> vector<8x32xf32>
    %cst_7 = arith.constant dense<0.000000e+00> : vector<8x32xf32>
    %24 = tpu.matmul %14, %13, %cst_7 {dimension_numbers = #tpu.dot_dimension_numbers<[1], [0], [0], [1], [0, 0, 1, 1], [], []>} : vector<8x8xf32>, vector<8x32xf32>, vector<8x32xf32> -> vector<8x32xf32>
    %cst_8 = arith.constant dense<0.000000e+00> : vector<8x32xf32>
    %25 = tpu.matmul %15, %23, %cst_8 {dimension_numbers = #tpu.dot_dimension_numbers<[1], [0], [0], [1], [0, 0, 1, 1], [], []>} : vector<8x8xf32>, vector<8x32xf32>, vector<8x32xf32> -> vector<8x32xf32>
    %26 = arith.addf %24, %25 : vector<8x32xf32>
    %27 = vector.broadcast %19 : vector<8x1xf32> to vector<8x32xf32>
    %28 = arith.addf %26, %27 : vector<8x32xf32>
    %cst_9 = arith.constant 0.000000e+00 : f32
    %29 = vector.broadcast %cst_9 : f32 to vector<8x32xf32>
    %30 = arith.maximumf %28, %29 : vector<8x32xf32>
    %cst_10 = arith.constant dense<0.000000e+00> : vector<8x32xf32>
    %31 = tpu.matmul %30, %12, %cst_10 {dimension_numbers = #tpu.dot_dimension_numbers<[1], [0], [0], [1], [0, 0, 1, 1], [], []>} : vector<8x32xf32>, vector<32x32xf32>, vector<8x32xf32> -> vector<8x32xf32>
    %cst_11 = arith.constant dense<0.000000e+00> : vector<16x32xf32>
    %32 = tpu.matmul %16, %30, %cst_11 {dimension_numbers = #tpu.dot_dimension_numbers<[1], [0], [0], [1], [0, 0, 1, 1], [], []>} : vector<16x8xf32>, vector<8x32xf32>, vector<16x32xf32> -> vector<16x32xf32>
    %cst_12 = arith.constant dense<0.000000e+00> : vector<16x32xf32>
    %33 = tpu.matmul %17, %31, %cst_12 {dimension_numbers = #tpu.dot_dimension_numbers<[1], [0], [0], [1], [0, 0, 1, 1], [], []>} : vector<16x8xf32>, vector<8x32xf32>, vector<16x32xf32> -> vector<16x32xf32>
    %34 = arith.addf %32, %33 : vector<16x32xf32>
    %35 = vector.broadcast %20 : vector<16x1xf32> to vector<16x32xf32>
    %36 = arith.addf %34, %35 : vector<16x32xf32>
    %cst_13 = arith.constant 0.000000e+00 : f32
    %37 = vector.broadcast %cst_13 : f32 to vector<16x32xf32>
    %38 = arith.maximumf %36, %37 : vector<16x32xf32>
    %cst_14 = arith.constant dense<0.000000e+00> : vector<32x32xf32>
    %39 = tpu.matmul %18, %38, %cst_14 {dimension_numbers = #tpu.dot_dimension_numbers<[1], [0], [0], [1], [0, 0, 1, 1], [], []>} : vector<32x16xf32>, vector<16x32xf32>, vector<32x32xf32> -> vector<32x32xf32>
    %40 = vector.broadcast %21 : vector<32x1xf32> to vector<32x32xf32>
    %41 = arith.addf %39, %40 : vector<32x32xf32>
    %cst_15 = arith.constant 0.000000e+00 : f32
    %42 = vector.broadcast %cst_15 : f32 to vector<32x32xf32>
    %43 = arith.maximumf %41, %42 : vector<32x32xf32>
    %44 = vector.broadcast %22 : vector<32x1xf32> to vector<32x32xf32>
    %45 = arith.mulf %43, %44 : vector<32x32xf32>
    %cst_16 = arith.constant dense<0.000000e+00> : vector<32xf32>
    %46 = vector.multi_reduction <add>, %45, %cst_16 [0] : vector<32x32xf32> to vector<32xf32>
    %47 = vector.shape_cast %46 : vector<32xf32> to vector<1x32xf32>
    %48 = vector.shape_cast %47 : vector<1x32xf32> to vector<1x1x32xf32>
    %cst_17 = arith.constant dense<0.000000e+00> : vector<1xf32>
    %49 = vector.multi_reduction <add>, %48, %cst_17 [1, 2] : vector<1x1x32xf32> to vector<1xf32>
    %50 = vector.shape_cast %49 : vector<1xf32> to vector<1x1x1xf32>
    %51 = vector.extract %50[0, 0, 0] : f32 from vector<1x1x1xf32>
    %cst_18 = arith.constant 3.200000e+01 : f32
    %52 = arith.divf %51, %cst_18 : f32
    %53 = vector.broadcast %52 : f32 to vector<1x32xf32>
    %54 = arith.subf %47, %53 : vector<1x32xf32>
    %c0_19 = arith.constant 0 : index
    %c0_20 = arith.constant 0 : index
    %55 = vector.load %arg3[%c0_19, %c0_20] : memref<1x32xf32, #tpu.memory_space<vmem>>, vector<1x32xf32>
    tpu.vector_store %arg3[%c0_19, %c0_20], %54 {strides = array<i32>} : memref<1x32xf32, #tpu.memory_space<vmem>>, vector<1x32xf32>,
    return
  }
}

</mosaic_0001>

<bundles_post_ra>
// kernel: forward.1
= control target key start
LH: loop header
LB: loop body
LE: loop exit
PB: predicated region body
PF: predicated region fallthrough
CT: control target
= control target key end

     0   :  { %v38_v0 = vlaneseq  ;;  %s629_s0 = inlined_call_operand.vmem [shape: s32[2,64], index: 0, kind: input, shape index: {}]   ;;  %s630_s1 = inlined_call_operand.vmem [shape: f32[8,32], index: 1, kind: input, shape index: {}]   ;;  %s631_s2 = inlined_call_operand.vmem [shape: f32[168,16], index: 2, kind: input, shape index: {}]   ;;  %s632_s3 = inlined_call_operand.hbm [shape: f32[1,32], index: 3, kind: output, shape index: {}]  }
   0x1   :  { %8 = vsyncpa [#allocation3], 0  ;;  %v478_v2 = vld [vmem:[%s629_s0 + $0x1] ss:$0 sm:$0xff]  ;;  %vm69_vm0 = vcmask 523264   ;;  %v508_v6 = vmov 0.0  }
   0x2   :  { %v39_v1 = vshrl.u32 %v38_v0, 7  ;;  %v479_v10 = vld [vmem:[%s629_s0] ss:$0 sm:$0xff]  ;;  %v25_v18 = vld [vmem:[%s631_s2 + $0x50] sm:$0xff]  ;;  %v509_v19 = vmov 0   ;;  %vm124_vm9 = vcmask 261120  }
   0x3   :  { %v123_v16 = vld [vmem:[%s630_s1] sm:$0xff]  ;;  %475 = vset.pattern.permute.xlu0 %v509_v19  ;;  %476 = vset.pattern.permute.xlu1 %v509_v19  ;;  %vm148_vm10 = vcmask 64512   ;;  %v34_v26 = vld [vmem:[%s631_s2 + $0x98] sm:$0xff]  ;;  %v16_v27 = vld [vmem:[%s631_s2 + $0x8] sm:$0xff]  ;;  %vm317_vm11 = vcmask 130048   ;;  %vm400_vm12 = vcmask 253952  }
   0x4   :  { %v42_v3 = vadd.s32 24, %v39_v1  ;;  %v41_v4 = vadd.s32 16, %v39_v1  ;;  %v40_v5 = vadd.s32 8, %v39_v1  ;;  %vm57_vm4 = vcmp.eq.s32.totalorder %v39_v1, %v478_v2  ;;  %190 = vmatpush.msra.mxu3 %v123_v16  ;;  %197 = vperm.xlu0 %475, %v25_v18   ;;  %v15_v23 = vld [vmem:[%s631_s2] sm:$0xff]  ;;  %v17_v35 = vld [vmem:[%s631_s2 + $0x10] sm:$0xff]  ;;  %v26_v36 = vld [vmem:[%s631_s2 + $0x58] sm:$0xff] }
   0x5   :  { %v443_v11 = vsel %vm57_vm4, 1.0, %v508_v6  ;;  %vm44_vm5 = vcmp.eq.s32.totalorder %v39_v1, %v479_v10  ;;  %477 = vset.pattern.permute.xlu2 %v509_v19  ;;  %457 = vmatmul.msk.f32.vlgmr.msra.gmra.mxu3 %vm148_vm10, %v15_v23  ;;  %v27_v24 = vld [vmem:[%s631_s2 + $0x60] sm:$0xff]  ;;  %v18_v37 = vld [vmem:[%s631_s2 + $0x18] sm:$0xff]  ;;  %v28_v38 = vld [vmem:[%s631_s2 + $0x68] sm:$0xff]  ;;  %s511_s30 = smov [#allocation2]   ;;  %s430_s8 = sshll.u32 %s632_s3, 4  ;;  %s431_s8 = int_to_ptr.hbm [resolvable:$true] %s430_s8 }
   0x6   :  { %vm60_vm1 = vcmp.eq.s32.totalorder %v42_v3, %v478_v2  ;;  %vm59_vm2 = vcmp.eq.s32.totalorder %v41_v4, %v478_v2  ;;  %vm58_vm3 = vcmp.eq.s32.totalorder %v40_v5, %v478_v2  ;;  %v439_v12 = vsel %vm44_vm5, 1.0, %v508_v6  ;;  %v31_v25 = vld [vmem:[%s631_s2 + $0x80] sm:$0xff]  ;;  %285 = vperm.xlu1 %476, %v26_v36   ;;  %v32_v39 = vld [vmem:[%s631_s2 + $0x88] sm:$0xff]  ;;  %v29_v52 = vld [vmem:[%s631_s2 + $0x70] sm:$0xff]  ;;  %s428_s4 = sshll.u32 %s511_s30, 4  ;;  %s429_s4 = int_to_ptr.vmem [resolvable:$true] %s428_s4 }
   0x7   :  { %v446_v7 = vsel %vm60_vm1, 1.0, %v508_v6  ;;  %v445_v8 = vsel %vm59_vm2, 1.0, %v508_v6  ;;  %v444_v9 = vsel %vm58_vm3, 1.0, %v508_v6  ;;  %vm45_vm6 = vcmp.eq.s32.totalorder %v40_v5, %v479_v10  ;;  %v35_v40 = vld [vmem:[%s631_s2 + $0xa0] sm:$0xff]  ;;  %v20_v43 = vld [vmem:[%s631_s2 + $0x28] sm:$0xff]  ;;  %304 = vperm.xlu2 %477, %v29_v52   ;;  %v21_v57 = vld [vmem:[%s631_s2 + $0x30] sm:$0xff] }
   0x8   :  { %447 = vmatpush.xpose.msk.msra.mxu0 %vm69_vm0, %v446_v7  ;;  %v440_v13 = vsel %vm45_vm6, 1.0, %v508_v6  ;;  %vm46_vm7 = vcmp.eq.s32.totalorder %v41_v4, %v479_v10  ;;  %vm47_vm8 = vcmp.eq.s32.totalorder %v42_v3, %v479_v10  ;;  %v19_v41 = vld [vmem:[%s631_s2 + $0x20] sm:$0xff]  ;;  %v30_v58 = vld [vmem:[%s631_s2 + $0x78] sm:$0xff]  ;;  %v33_v60 = vld [vmem:[%s631_s2 + $0x90] sm:$0xff] }
   0x9   :  { %v441_v14 = vsel %vm46_vm7, 1.0, %v508_v6  ;;  %v442_v15 = vsel %vm47_vm8, 1.0, %v508_v6  ;;  %v22_v59 = vld [vmem:[%s631_s2 + $0x38] sm:$0xff]  ;;  %v23_v61 = vld [vmem:[%s631_s2 + $0x40] sm:$0xff]  ;;  %v24_v62 = vld [vmem:[%s631_s2 + $0x48] sm:$0xff] }
   0xc   :  { %448 = vmatpush.xpose.msk.msra.mxu0 %vm69_vm0, %v445_v8  ;;  %290 = vperm.xlu0 %475, %v27_v24  }
   0xe   :  { %299 = vperm.xlu1 %476, %v28_v38  }
   0xf   :  { %309 = vperm.xlu2 %477, %v30_v58  }
  0x10   :  { %449 = vmatpush.xpose.msk.msra.mxu0 %vm69_vm0, %v444_v9 }
  0x14   :  { %450 = vmatpush.xpose.msk.msra.mxu0 %vm69_vm0, %v443_v11  ;;  %314 = vperm.xlu0 %475, %v31_v25  }
  0x16   :  { %365 = vperm.xlu1 %476, %v32_v39  }
  0x17   :  { %451 = vmatmul.msk.f32.vlgmr.msra.gmra.mxu0 %vm69_vm0, %v439_v12  ;;  %370 = vperm.xlu2 %477, %v33_v60  }
  0x1c   :  { %375 = vperm.xlu0 %475, %v34_v26  }
  0x1e   :  { %380 = vperm.xlu1 %476, %v35_v40  }
  0x1f   :  { %452 = vmatmul.msk.f32.gmra.mxu0 %vm69_vm0, %v440_v13 }
  0x27   :  { %453 = vmatmul.msk.f32.gmra.mxu0 %vm69_vm0, %v441_v14 }
  0x2f   :  { %454 = vmatmul.msk.f32.gmra.mxu0 %vm69_vm0, %v442_v15 }
  0x61   :  { %v305_v63 = vpop.permute.xlu2 %304 }
  0x69   :  { %v310_v3 = vpop.permute.xlu2 %309 }
  0x71   :  { %v371_v13 = vpop.permute.xlu2 %370 }
  0x76   :  { %v198_v32 = vpop.permute.xlu0 %197 }
  0x78   :  { %v286_v51 = vpop.permute.xlu1 %285 }
  0x7e   :  { %v291_v50 = vpop.permute.xlu0 %290 }
  0x80   :  { %v300_v1 = vpop.permute.xlu1 %299 }
  0x86   :  { %v315_v4 = vpop.permute.xlu0 %314 }
  0x88   :  { %v192_v29 = vpop.f32.mrf.mxu3  ;;  %v366_v10 = vpop.permute.xlu1 %365 }
  0x8e   :  { %v376_v15 = vpop.permute.xlu0 %375 }
  0x90   :  { %v381_v24 = vpop.permute.xlu1 %380 }
  0x94   :  { %v111_v17 = vpop.f32.mrf.mxu0 }
  0x9c   :  { %v114_v20 = vpop.f32.mrf.mxu0 }
  0xa4   :  { %v117_v21 = vpop.f32.mrf.mxu0 }
  0xac   :  { %v120_v22 = vpop.f32.mrf.mxu0 }
  0xad   :  { %140 = vmatpush.msra.mxu1 %v120_v22  ;;  %217 = vmatpush.msrb.mxu3 %v120_v22 }
  0xaf   :  { %141 = vmatpush.msra.mxu1 %v117_v21  ;;  %218 = vmatpush.msrb.mxu3 %v117_v21 }
  0xb1   :  { %142 = vmatpush.msra.mxu1 %v114_v20  ;;  %219 = vmatpush.msrb.mxu3 %v114_v20 }
  0xb3   :  { %143 = vmatpush.msra.mxu1 %v111_v17  ;;  %220 = vmatpush.msrb.mxu3 %v111_v17 }
  0xb4   :  { %455 = vmatmul.msk.f32.vlgmr.msra.gmra.mxu1 %vm124_vm9, %v123_v16 }
 0x131   :  { %v145_v28 = vpop.f32.mrf.mxu1 }
 0x132   :  { %167 = vmatpush.msra.mxu2 %v145_v28 }
 0x133   :  { %456 = vmatmul.msk.f32.vlgmr.msra.gmra.mxu2 %vm148_vm10, %v16_v27 }
 0x1b6   :  { %v169_v30 = vpop.f32.mrf.mxu2 }
 0x1b7   :  { %v193_v31 = vadd.f32 %v192_v29, %v169_v30 }
 0x1b9   :  { %v200_v33 = vadd.f32 %v198_v32, %v193_v31 }
 0x1bb   :  { %v201_v34 = vmax.f32 %v200_v33, 0.0 }
 0x1bd   :  { %458 = vmatmul.msk.f32.vlgmr.msrb.gmra.mxu3 %vm124_vm9, %v201_v34  ;;  %275 = vmatpush.msrb.mxu1 %v201_v34 }
 0x1be   :  { %461 = vmatmul.msk.f32.vlgmr.msrb.gmra.mxu1 %vm148_vm10, %v17_v35 }
 0x1c6   :  { %462 = vmatmul.msk.f32.gmra.mxu1 %vm148_vm10, %v18_v37  ;;  %v510_v37 = vmov 32.0  }
 0x1c7   :  { %480 = vrcp.f32 %v510_v37 }
 0x1cd   :  { %v481_v38 = vpop.eup %480 }
 0x1ce   :  { %v412_v39 = vmul.f32 32.0, %v481_v38  ;;  %vm416_vm13 = vweird.f32 %v481_v38 }
 0x1d0   :  { %v413_v40 = vsub.f32 1.0, %v412_v39 }
 0x23b   :  { %v277_v44 = vpop.f32.mrf.mxu1 }
 0x240   :  { %v222_v42 = vpop.f32.mrf.mxu3 }
 0x241   :  { %246 = vmatpush.msra.mxu3 %v222_v42 }
 0x242   :  { %459 = vmatmul.msk.f32.vlgmr.msra.gmra.mxu3 %vm148_vm10, %v19_v41 }
 0x243   :  { %v280_v46 = vpop.f32.mrf.mxu1 }
 0x24a   :  { %460 = vmatmul.msk.f32.gmra.mxu3 %vm148_vm10, %v20_v43 }
 0x2c5   :  { %v248_v45 = vpop.f32.mrf.mxu3 }
 0x2c6   :  { %v278_v47 = vadd.f32 %v277_v44, %v248_v45  ;;  %v414_v44 = vmul.f32 %v481_v38, %v413_v40 }
 0x2c8   :  { %v293_v54 = vadd.f32 %v286_v51, %v278_v47  ;;  %v415_v47 = vadd.f32 %v481_v38, %v414_v44 }
 0x2ca   :  { %v295_v56 = vmax.f32 %v293_v54, 0.0 }
 0x2cd   :  { %v251_v48 = vpop.f32.mrf.mxu3 }
 0x2ce   :  { %v281_v49 = vadd.f32 %v280_v46, %v251_v48 }
 0x2d0   :  { %v294_v53 = vadd.f32 %v291_v50, %v281_v49  ;;  %v417_v50 = vsel %vm416_vm13, %v481_v38, %v415_v47 }
 0x2d2   :  { %v296_v55 = vmax.f32 %v294_v53, 0.0 }
 0x2d4   :  { %344 = vmatpush.msrb.mxu2 %v296_v55 }
 0x2d6   :  { %345 = vmatpush.msrb.mxu2 %v295_v56 }
 0x2d7   :  { %463 = vmatmul.msk.f32.vlgmr.msrb.gmra.mxu2 %vm317_vm11, %v21_v57 }
 0x2df   :  { %464 = vmatmul.msk.f32.gmra.mxu2 %vm317_vm11, %v22_v59 }
 0x2e7   :  { %465 = vmatmul.msk.f32.gmra.mxu2 %vm317_vm11, %v23_v61 }
 0x2ef   :  { %466 = vmatmul.msk.f32.gmra.mxu2 %vm317_vm11, %v24_v62 }
 0x35a   :  { %v347_v0 = vpop.f32.mrf.mxu2 }
 0x35b   :  { %v348_v6 = vadd.f32 %v347_v0, %v300_v1 }
 0x35d   :  { %v359_v11 = vmax.f32 %v348_v6, 0.0 }
 0x35f   :  { %v383_v16 = vmul.f32 %v366_v10, %v359_v11 }
 0x361   :  { %v387_v21 = vsel %vm124_vm9, %v383_v16, 0.0 }
 0x362   :  { %v350_v2 = vpop.f32.mrf.mxu2 }
 0x363   :  { %v351_v5 = vadd.f32 %v350_v2, %v305_v63 }
 0x365   :  { %v360_v8 = vmax.f32 %v351_v5, 0.0 }
 0x367   :  { %v384_v14 = vmul.f32 %v371_v13, %v360_v8 }
 0x369   :  { %v388_v19 = vsel %vm124_vm9, %v384_v14, 0.0 }
 0x36a   :  { %v353_v7 = vpop.f32.mrf.mxu2  ;;  %v389_v25 = vadd.f32 %v388_v19, %v387_v21 }
 0x36b   :  { %v354_v9 = vadd.f32 %v353_v7, %v310_v3 }
 0x36d   :  { %v361_v12 = vmax.f32 %v354_v9, 0.0 }
 0x36f   :  { %v385_v17 = vmul.f32 %v376_v15, %v361_v12 }
 0x371   :  { %v390_v22 = vsel %vm124_vm9, %v385_v17, 0.0 }
 0x372   :  { %v356_v18 = vpop.f32.mrf.mxu2  ;;  %v391_v27 = vadd.f32 %v390_v22, %v389_v25 }
 0x373   :  { %v357_v20 = vadd.f32 %v356_v18, %v315_v4 }
 0x375   :  { %v362_v23 = vmax.f32 %v357_v20, 0.0 }
 0x377   :  { %v386_v26 = vmul.f32 %v381_v24, %v362_v23 }
 0x379   :  { %v392_v28 = vsel %vm124_vm9, %v386_v26, 0.0 }
 0x37a   :  { %v393_v29 = vadd.f32 %v392_v28, %v391_v27 }
 0x37c   :  { %v394_v30 = vrot.slane %v393_v29, 4 }
 0x37e   :  { %v395_v31 = vadd.f32 %v394_v30, %v393_v29 }
 0x380   :  { %v396_v32 = vrot.slane %v395_v31, 2 }
 0x382   :  { %v397_v33 = vadd.f32 %v396_v32, %v395_v31 }
 0x384   :  { %v398_v34 = vrot.slane %v397_v33, 1 }
 0x386   :  { %v399_v35 = vadd.f32 %v398_v34, %v397_v33 }
 0x388   :  { %v401_v36 = vsel %vm400_vm12, %v399_v35, 0.0 }
 0x389   :  { %402 = vadd.xlane.f32.xlu2 %v401_v36 }
 0x3fc   :  { %v403_v41 = vpop.xlane.xlu2 %402 }
 0x3fd   :  { %v404_v42 = vrot.slane %v403_v41, 4 }
 0x3ff   :  { %v405_v43 = vadd.f32 %v404_v42, %v403_v41 }
 0x401   :  { %v406_v45 = vrot.slane %v405_v43, 2 }
 0x403   :  { %v407_v46 = vadd.f32 %v406_v45, %v405_v43 }
 0x405   :  { %v408_v48 = vrot.slane %v407_v46, 1 }
 0x407   :  { %v409_v49 = vadd.f32 %v408_v48, %v407_v46 }
 0x409   :  { %467 = vpush %v409_v49 }
 0x40a   :  { %469 = vpush %v417_v50 }
 0x43a   :  { %s468_s2 = spop %467 }
 0x43b   :  { %s470_s29 = spop %469 }
 0x43c   :  { %s419_s5 = smul.f32 %s470_s29, %s468_s2 }
 0x43e   :  { %v420_v51 = vstv %s419_s5 }
 0x43f   :  { %v421_v52 = vsub.f32 %v399_v35, %v420_v51 }
 0x441   :  { %422 = vst.msk [vmem:[#allocation2] sm:$0x1] %vm400_vm12, %v421_v52 }
 0x442   :  { %433 = dma.vmem_to_hbm [thread:$0]  %s429_s4, 16, %s431_s8, [#allocation3]  }
 0x443   :  { %506 = dma.done.wait [#allocation3], 16  }
 0x444   :  { %507 = vsyncadd [#allocation3], 4294967280 }
 0x445   :  { %438 = vsyncpa [#allocation3], 1 }

</bundles_post_ra>
